<compile_context>
chip_gen: v5e
topology: v5e:2x2
jax: 0.10.0
libtpu: 0.0.40
codegen_flags: <defaults>
</compile_context>

<pallas_src>
import functools
import math

import jax
import jax.numpy as jnp
from jax.experimental import pallas as pl
from jax.experimental.pallas import tpu as pltpu

_LANES = 128
_SUBLANES = 8


def _vae_bce_sum_kernel(pred_ref, lab_ref, partial_ref, *, assume_binary_labels):
    i = pl.program_id(1)

    @pl.when(i == 0)
    def _():
        partial_ref[...] = jnp.zeros_like(partial_ref)

    p = pred_ref[...].astype(jnp.float32)
    y = lab_ref[...].astype(jnp.float32)

    if assume_binary_labels:
        # One log per element instead of two (EUP-slot relief, mainly for v7x).
        # Only valid when labels are exactly 0/1.
        chosen = jnp.where(y > 0.5, p, 1.0 - p)
        bce_tile = -jnp.maximum(jnp.log(chosen), jnp.float32(-100.0))
    else:
        # Exact PyTorch BCELoss semantics: both log terms clamped at -100.
        log_p = jnp.maximum(jnp.log(p), jnp.float32(-100.0))
        log_1mp = jnp.maximum(jnp.log(1.0 - p), jnp.float32(-100.0))
        bce_tile = -(y * log_p + (1.0 - y) * log_1mp)

    # Fold (tile_rows, 128) -> (8, 128) with pure VPU adds; the cross-lane
    # reduction to a scalar is done once, outside the kernel.
    tile_rows = bce_tile.shape[0]
    folded = jnp.sum(
        bce_tile.reshape(tile_rows // _SUBLANES, _SUBLANES, _LANES), axis=0
    )
    partial_ref[...] += folded


def vae_loss_bce(raw_predictions, labels_tensor, mu, logvar, *,
                 tile_rows=1024, num_slices=2, assume_binary_labels=False):
    total = int(math.prod(raw_predictions.shape))

    pred_flat = raw_predictions.reshape(-1)
    lab_flat = labels_tensor.reshape(-1)

    # Rows of 128 lanes needed to hold all elements.
    rows = -(-total // _LANES)

    # Clamp the tile so tiny inputs still work; keep it a multiple of 8.
    rows_up8 = -(-rows // _SUBLANES) * _SUBLANES
    tile_rows = max(_SUBLANES, min(int(tile_rows), rows_up8))
    tile_rows = (tile_rows // _SUBLANES) * _SUBLANES

    # Pad so rows is a multiple of num_slices * tile_rows.  Zero padding is
    # neutral for the BCE sum: y=0, p=0  ->  -(0*(-100) + 1*log(1)) = 0.
    chunk = num_slices * tile_rows
    padded_rows = -(-rows // chunk) * chunk
    pad = padded_rows * _LANES - total
    if pad:
        pred_flat = jnp.pad(pred_flat, (0, pad))
        lab_flat = jnp.pad(lab_flat, (0, pad))

    pred2d = pred_flat.reshape(padded_rows, _LANES)
    lab2d = lab_flat.reshape(padded_rows, _LANES)

    steps = padded_rows // chunk  # grid steps per slice / core

    kernel = functools.partial(
        _vae_bce_sum_kernel, assume_binary_labels=assume_binary_labels
    )

    partials = pl.pallas_call(
        kernel,
        out_shape=jax.ShapeDtypeStruct((num_slices * _SUBLANES, _LANES), jnp.float32),
        grid_spec=pltpu.PrefetchScalarGridSpec(
            num_scalar_prefetch=0,
            grid=(num_slices, steps),
            in_specs=[
                pl.BlockSpec((tile_rows, _LANES), lambda c, i: (c * steps + i, 0)),
                pl.BlockSpec((tile_rows, _LANES), lambda c, i: (c * steps + i, 0)),
            ],
            # One resident (8,128) partial-sum block per slice/core.
            out_specs=pl.BlockSpec((_SUBLANES, _LANES), lambda c, i: (c, 0)),
        ),
        compiler_params=pltpu.CompilerParams(
            dimension_semantics=("parallel", "arbitrary"),
        ),
    )(pred2d, lab2d)

    bce = jnp.sum(partials)

    # KLD is a tiny [B, latent] reduction -> plain jnp in the wrapper (per review).
    mu_f = mu.astype(jnp.float32)
    lv_f = logvar.astype(jnp.float32)
    kld = -0.5 * jnp.sum(1.0 + lv_f - mu_f * mu_f - jnp.exp(lv_f))

    return (bce + kld).astype(jnp.float32)


def vae_loss_bce_ref(raw_predictions, labels_tensor, mu, logvar):
    p = raw_predictions.astype(jnp.float32)
    y = labels_tensor.astype(jnp.float32)
    log_p = jnp.maximum(jnp.log(p), -100.0)
    log_1mp = jnp.maximum(jnp.log(1.0 - p), -100.0)
    bce = jnp.sum(-(y * log_p + (1.0 - y) * log_1mp))
    kld = -0.5 * jnp.sum(1.0 + logvar - mu**2 - jnp.exp(logvar))
    return bce + kld


if __name__ == "__main__":
    key = jax.random.PRNGKey(0)
    k1, k2, k3, k4 = jax.random.split(key, 4)

    B, C, H, W = 2, 4, 16, 16      # NCHW predictions / labels
    latent = 32                    # mu / logvar: [B, latent]

    # Predictions are probabilities (module expects post-sigmoid outputs).
    raw_predictions = jax.nn.sigmoid(
        jax.random.normal(k1, (B, C, H, W), dtype=jnp.float32)
    )
    labels_tensor = jax.random.bernoulli(k2, 0.5, (B, C, H, W)).astype(jnp.float32)
    mu = jax.random.normal(k3, (B, latent), dtype=jnp.float32)
    logvar = 0.1 * jax.random.normal(k4, (B, latent), dtype=jnp.float32)

    ref = vae_loss_bce_ref(raw_predictions, labels_tensor, mu, logvar)

    # General (exact BCELoss) path.
    out_general = vae_loss_bce(raw_predictions, labels_tensor, mu, logvar)
    out_general = jax.block_until_ready(out_general)
    assert jnp.allclose(out_general, ref, rtol=1e-4, atol=1e-2), (out_general, ref)

    # Single-log fast path (labels here are exactly 0/1).
    out_binary = vae_loss_bce(
        raw_predictions, labels_tensor, mu, logvar, assume_binary_labels=True
    )
    out_binary = jax.block_until_ready(out_binary)
    assert jnp.allclose(out_binary, ref, rtol=1e-4, atol=1e-2), (out_binary, ref)

    print("KERNEL_OK")
</pallas_src>

<mosaic_0001>
module attributes {stable_mosaic.version = 11 : i64} {
  func.func @_vae_bce_sum_kernel(%arg0: i32, %arg1: i32, %arg2: memref<16x128xf32, #tpu.memory_space<vmem>>, %arg3: memref<16x128xf32, #tpu.memory_space<vmem>>, %arg4: memref<8x128xf32, #tpu.memory_space<vmem>>) attributes {dimension_semantics = [#tpu.dimension_semantics<parallel>, #tpu.dimension_semantics<arbitrary>], iteration_bounds = array<i64: 2, 1>, scalar_prefetch = 0 : i64, scratch_operands = 0 : i64, tpu.core_type = #tpu.core_type<tc>, window_params = [{transform_indices = @transform_0, window_bounds = array<i64: 16, 128>}, {transform_indices = @transform_1, window_bounds = array<i64: 16, 128>}, {transform_indices = @transform_2, window_bounds = array<i64: 8, 128>}]} {
    %c0_i32 = arith.constant 0 : i32
    %0 = arith.cmpi eq, %arg1, %c0_i32 : i32
    %1 = arith.extui %0 : i1 to i32
    %c0_i32_0 = arith.constant 0 : i32
    %2 = arith.cmpi ne, %1, %c0_i32_0 : i32
    scf.if %2 {
      %cst_13 = arith.constant 0.000000e+00 : f32
      %25 = vector.broadcast %cst_13 : f32 to vector<8x128xf32>
      %c0_14 = arith.constant 0 : index
      %c0_15 = arith.constant 0 : index
      %26 = vector.load %arg4[%c0_14, %c0_15] : memref<8x128xf32, #tpu.memory_space<vmem>>, vector<8x128xf32>
      tpu.vector_store %arg4[%c0_14, %c0_15], %25 {strides = array<i32>} : memref<8x128xf32, #tpu.memory_space<vmem>>, vector<8x128xf32>,
    } else {
    }
    %c0 = arith.constant 0 : index
    %c0_1 = arith.constant 0 : index
    %3 = vector.load %arg2[%c0, %c0_1] : memref<16x128xf32, #tpu.memory_space<vmem>>, vector<16x128xf32>
    %c0_2 = arith.constant 0 : index
    %c0_3 = arith.constant 0 : index
    %4 = vector.load %arg3[%c0_2, %c0_3] : memref<16x128xf32, #tpu.memory_space<vmem>>, vector<16x128xf32>
    %5 = math.log %3 : vector<16x128xf32>
    %cst = arith.constant -1.000000e+02 : f32
    %6 = vector.broadcast %cst : f32 to vector<16x128xf32>
    %7 = arith.maximumf %5, %6 : vector<16x128xf32>
    %cst_4 = arith.constant 1.000000e+00 : f32
    %8 = vector.broadcast %cst_4 : f32 to vector<16x128xf32>
    %9 = arith.subf %8, %3 : vector<16x128xf32>
    %10 = math.log %9 : vector<16x128xf32>
    %cst_5 = arith.constant -1.000000e+02 : f32
    %11 = vector.broadcast %cst_5 : f32 to vector<16x128xf32>
    %12 = arith.maximumf %10, %11 : vector<16x128xf32>
    %13 = arith.mulf %4, %7 : vector<16x128xf32>
    %cst_6 = arith.constant 1.000000e+00 : f32
    %14 = vector.broadcast %cst_6 : f32 to vector<16x128xf32>
    %15 = arith.subf %14, %4 : vector<16x128xf32>
    %16 = arith.mulf %15, %12 : vector<16x128xf32>
    %17 = arith.addf %13, %16 : vector<16x128xf32>
    %cst_7 = arith.constant 0.000000e+00 : f32
    %18 = vector.broadcast %cst_7 : f32 to vector<16x128xf32>
    %19 = arith.subf %18, %17 : vector<16x128xf32>
    %20 = vector.shape_cast %19 : vector<16x128xf32> to vector<2x8x128xf32>
    %cst_8 = arith.constant dense<0.000000e+00> : vector<8x128xf32>
    %21 = vector.multi_reduction <add>, %20, %cst_8 [0] : vector<2x8x128xf32> to vector<8x128xf32>
    %c0_9 = arith.constant 0 : index
    %c0_10 = arith.constant 0 : index
    %22 = vector.load %arg4[%c0_9, %c0_10] : memref<8x128xf32, #tpu.memory_space<vmem>>, vector<8x128xf32>
    %23 = arith.addf %22, %21 : vector<8x128xf32>
    %c0_11 = arith.constant 0 : index
    %c0_12 = arith.constant 0 : index
    %24 = vector.load %arg4[%c0_11, %c0_12] : memref<8x128xf32, #tpu.memory_space<vmem>>, vector<8x128xf32>
    tpu.vector_store %arg4[%c0_11, %c0_12], %23 {strides = array<i32>} : memref<8x128xf32, #tpu.memory_space<vmem>>, vector<8x128xf32>,
    return
  }
  func.func @transform_0(%arg0: i32, %arg1: i32) -> (i32, i32) {
    %c1_i32 = arith.constant 1 : i32
    %0 = arith.muli %arg0, %c1_i32 : i32
    %1 = arith.addi %0, %arg1 : i32
    %c0_i32 = arith.constant 0 : i32
    %c0_i32_0 = arith.constant 0 : i32
    return %1, %c0_i32 : i32, i32
  }
  func.func @transform_1(%arg0: i32, %arg1: i32) -> (i32, i32) {
    %c1_i32 = arith.constant 1 : i32
    %0 = arith.muli %arg0, %c1_i32 : i32
    %1 = arith.addi %0, %arg1 : i32
    %c0_i32 = arith.constant 0 : i32
    %c0_i32_0 = arith.constant 0 : i32
    return %1, %c0_i32 : i32, i32
  }
  func.func @transform_2(%arg0: i32, %arg1: i32) -> (i32, i32) {
    %c0_i32 = arith.constant 0 : i32
    %c0_i32_0 = arith.constant 0 : i32
    return %arg0, %c0_i32 : i32, i32
  }
}

</mosaic_0001>

<bundles_post_ra>
// kernel: tpu_custom_call.1
= control target key start
LH: loop header
LB: loop body
LE: loop exit
PB: predicated region body
PF: predicated region fallthrough
CT: control target
= control target key end

     0   :  { %7 = vsyncpa [#allocation3], 0  ;;  %s789_s0 = inlined_call_operand.hbm [shape: f32[32,128], index: 0, kind: input, shape index: {}]   ;;  %s790_s1 = inlined_call_operand.hbm [shape: f32[32,128], index: 1, kind: input, shape index: {}]   ;;  %s791_s2 = inlined_call_operand.hbm [shape: f32[16,128], index: 2, kind: output, shape index: {}]  }
   0x1   :  { %9 = vsyncpa [#allocation3 + $0x1], 0 }
   0x2   :  { %10 = vsyncpa [#allocation6], 0 }
   0x3   :  { %12 = vsyncpa [#allocation6 + $0x1], 0 }
   0x4   :  { %13 = vsyncpa [#allocation4], 0 }
   0x5   :  { %15 = vsyncpa [#allocation4 + $0x1], 0  ;;  %s647_s9 = smov 0   ;;  %s649_s10 = smov 0  }
   0x6   :  { %s651_s11 = smov 0   ;;  %s653_s12 = smov 0  }
   0x7   :  { %s655_s13 = smov 0   ;;  %s657_s14 = smov 0  }
   0x8 LB: > { %s384_s15 = sadd.s32 4294967295, %s628_s14   ;;  %s385_s16 = sadd.s32 4294967294, %s628_s14   ;;  %s628_s14 = sphi %s657_s14, %s21_s14   ;;  %s624_s13 = sphi %s655_s13, %s801_s13   ;;  %s620_s12 = sphi %s653_s12, %s800_s12   ;;  %s616_s11 = sphi %s651_s11, %s799_s11   ;;  %s612_s10 = sphi %s649_s10, %s798_s10   ;;  %s608_s9 = sphi %s647_s9, %s797_s9  }
   0x9   : > { %s33_s17 = sadd.s32 1, %s624_s13  ;;  %s42_s18 = sadd.s32 1, %s616_s11 }
   0xa   : > { %p35_p0 = scmp.ge.s32.totalorder %s33_s17, 2  ;;  %p49_p1 = scmp.ne.s32.totalorder %s616_s11, %s612_s10 }
   0xb   : > { %p50_p2 = scmp.eq.s32.totalorder %s628_s14, 0  ;;  %p55_p3 = scmp.ne.s32.totalorder %s612_s10, %s608_s9 }
   0xc   : > { %s803_s17 = smov (%p35_p0, %s33_s17), 0  ;;  %p56_p5 = scmp.eq.s32.totalorder %s384_s15, 0 }
   0xd   : > { %p688_p4 = por %p50_p2, %p49_p1  ;;  %s39_s20 = ssub.s32 %s624_s13, %s803_s17 }
   0xe   : > { %p107_p6 = scmp.eq.s32.totalorder %s384_s15, 1  ;;  %p40_p7 = scmp.eq.s32.totalorder %s39_s20, 0 }
   0xf   : > { %p694_p8 = por %p56_p5, %p55_p3  ;;  %p113_p10 = scmp.eq.s32.totalorder %s385_s16, 1 }
  0x10   : > { %p698_p9 = por %p107_p6, %p49_p1  ;;  %p387_p12 = scmp.ge.s32.totalorder %s628_s14, 2 }
  0x11   : > { %s703_s23 = scalar_select %p40_p7, %s616_s11, %s42_s18  }
  0x12   : > { %p705_p11 = por %p113_p10, %p55_p3  ;;  %p421_p13 = scmp.lt.s32.totalorder %s628_s14, 2 }
  0x13   : > { %s712_s25 = sand.u32 1, %s616_s11   ;;  %s402_s27 = sshll.u32 %s624_s13, 4 }
  0x14   : > { %s388_s26 = sshll.u32 %s712_s25, 4  ;;  %s143_s30 = scalar_lea.hbm %s789_s0, %s402_s27 }
  0x15   : > { %s137_s3 = scalar_lea.vmem [#allocation2], %s388_s26  ;;  %s144_s5 = sshll.u32 %s143_s30, 4  ;;  %s145_s5 = int_to_ptr.hbm [resolvable:$true] %s144_s5 }
  0x16   : > { %s146_s4 = sshll.u32 %s137_s3, 4  ;;  %p721_p0 = pnand %p421_p13, %p688_p4  ;;  %s147_s4 = int_to_ptr.vmem [resolvable:$true] %s146_s4 }
  0x17   : > { %p394_p1 = scmp.ge.s32.totalorder %s628_s14, 1  ;;  %s134_s7 = scalar_lea.sflag [#allocation3], %s712_s25 }
  0x18   : > { %s630_s8 = smov 128   ;;  %s631_s15 = smov 8  }
  0x19   : > { %413 = dma.hbm_to_vmem [thread:$0]  (!%p721_p0), %s145_s5, 256, %s147_s4, %s134_s7, %s630_s8, %s630_s8, %s631_s15  }
  0x1a   : > { %p177_p2 = scmp.lt.s32.totalorder %s628_s14, 3  ;;  %s166_s20 = scalar_lea.hbm %s790_s1, %s402_s27 }
  0x1b   : > { %s167_s28 = sshll.u32 %s166_s20, 4  ;;  %s160_s19 = scalar_lea.vmem [#allocation5], %s388_s26  ;;  %s168_s28 = int_to_ptr.hbm [resolvable:$true] %s167_s28 }
  0x1c   : > { %p178_p3 = pnand %p394_p1, %p177_p2  ;;  %s169_s29 = sshll.u32 %s160_s19, 4  ;;  %s170_s29 = int_to_ptr.vmem [resolvable:$true] %s169_s29 }
  0x1d   : > { %s157_s30 = scalar_lea.sflag [#allocation6], %s712_s25  ;;  %s737_s3 = sand.u32 (!%p178_p3), 1, %s612_s10  }
  0x1e   : > { %416 = dma.hbm_to_vmem [thread:$0]  (!%p721_p0), %s168_s28, 256, %s170_s29, %s157_s30, %s630_s8, %s630_s8, %s631_s15  }
  0x1f   : > { %181 = sbr.rel (%p178_p3) target bundleno = 65 (0x41), region = 28  ;;  %s395_s4 = sshll.u32 (!%p178_p3), %s737_s3, 4 }
  0x20   : > { %s184_s5 = scalar_lea.sflag (!%p178_p3), [#allocation3], %s737_s3  ;;  %s187_s7 = scalar_lea.vmem (!%p178_p3), [#allocation2], %s395_s4 }
  0x24   : > { %595 = dma.done.wait (%p694_p8), %s184_s5, 256  }
  0x25   : > { %597 = vsyncadd (%p694_p8), %s184_s5, 4294967040  ;;  %s194_s25 = scalar_lea.sflag [#allocation6], %s737_s3  ;;  %s197_s26 = scalar_lea.vmem [#allocation5], %s395_s4 }
  0x26   : > { %599 = dma.done.wait (%p694_p8), %s194_s25, 256  }
  0x27   : > { %601 = vsyncadd (%p694_p8), %s194_s25, 4294967040  ;;  %v233_v0 = vld [vmem:[%s187_s7] sm:$0xff]  ;;  %v234_v1 = vld [vmem:[%s187_s7 + $0x8] sm:$0xff]  ;;  %s397_s21 = sshll.u32 %s737_s3, 3  ;;  %s399_s27 = sshll.u32 %s620_s12, 3 }
  0x28   : > { %474 = vlog2.f32 %v233_v0  ;;  %v243_v2 = vsub.f32 1.0, %v233_v0  ;;  %v244_v3 = vsub.f32 1.0, %v234_v1  ;;  %v235_v5 = vld [vmem:[%s197_s26] sm:$0xff]  ;;  %v236_v7 = vld [vmem:[%s197_s26 + $0x8] sm:$0xff]  ;;  %s276_s15 = scalar_lea.hbm %s791_s2, %s399_s27  ;;  %s223_s16 = scalar_lea.vmem [#allocation7], %s397_s21 }
  0x29   : > { %476 = vlog2.f32 %v234_v1  ;;  %v253_v14 = vsub.f32 1.0, %v235_v5  ;;  %v254_v17 = vsub.f32 1.0, %v236_v7  ;;  %s278_s18 = sshll.u32 %s223_s16, 4  ;;  %s280_s20 = sshll.u32 %s276_s15, 4  ;;  %s279_s18 = int_to_ptr.vmem [resolvable:$true] %s278_s18  ;;  %s281_s20 = int_to_ptr.hbm [resolvable:$true] %s280_s20 }
  0x2a   : > { %478 = vlog2.f32 %v243_v2  ;;  %s266_s28 = scalar_lea.sflag [#allocation4], %s737_s3  ;;  %s556_s19 = sshra.s32 %s281_s20, 4  ;;  %s557_s19 = int_to_ptr.hbm [resolvable:$true] %s556_s19 }
  0x2b   : > { %480 = vlog2.f32 %v244_v3  ;;  %s558_s12 = scalar_lea.hbm %s557_s19, 8  ;;  %s562_s4 = scalar_lea.hbm %s791_s2, 16 }
  0x2c   : > { %p559_p4 = scmp.ne.s32.totalorder %s557_s19, %s558_s12  ;;  %p563_p7 = scmp.lt.s32.totalorder %s557_s19, %s791_s2 }
  0x2d   : > { %p564_p8 = scmp.lt.s32.totalorder %s562_s4, %s558_s12 }
  0x2e   : > { %v475_v4 = vpop.eup %474  ;;  %p560_p5 = pnand %p559_p4, %p698_p9 }
  0x2f   : > { %v477_v6 = vpop.eup %476  ;;  %v238_v8 = vmul.f32 0.6931472, %v475_v4  ;;  %p565_p10 = por %p564_p8, %p563_p7 }
  0x30   : > { %v479_v9 = vpop.eup %478  ;;  %v240_v10 = vmul.f32 0.6931472, %v477_v6  ;;  %p561_p6 = pneg %p560_p5 }
  0x31   : > { %v481_v11 = vpop.eup %480  ;;  %v241_v12 = vmax.f32 %v238_v8, -100.0  ;;  %v246_v13 = vmul.f32 0.6931472, %v479_v9 }
  0x32   : > { %v242_v15 = vmax.f32 %v240_v10, -100.0  ;;  %v248_v16 = vmul.f32 0.6931472, %v481_v11  ;;  %p566_p13 = pnand %p565_p10, %p561_p6 }
  0x33   : > { %v249_v18 = vmax.f32 %v246_v13, -100.0  ;;  %v251_v19 = vmul.f32 %v241_v12, %v235_v5 }
  0x34   : > { %v250_v20 = vmax.f32 %v248_v16, -100.0  ;;  %v252_v21 = vmul.f32 %v242_v15, %v236_v7 }
  0x35   : > { %v255_v22 = vmul.f32 %v253_v14, %v249_v18 }
  0x36   : > { %v256_v23 = vmul.f32 %v254_v17, %v250_v20 }
  0x37   : > { %v257_v24 = vadd.f32 %v255_v22, %v251_v19 }
  0x38   : > { %v258_v25 = vadd.f32 %v256_v23, %v252_v21 }
  0x39   : > { %v259_v26 = vsub.f32 0.0, %v257_v24 }
  0x3a   : > { %v260_v27 = vsub.f32 0.0, %v258_v25 }
  0x3c   : > { %v261_v28 = vadd.f32 %v260_v27, %v259_v26 }
  0x3e   : > { %264 = vst [vmem:[%s223_s16] sm:$0xff] %v261_v28 }
  0x3f   : > { %569 = shalt.err (!%p566_p13)
}
  0x40   : > { %408 = dma.vmem_to_hbm [thread:$0]  (%p698_p9), %s279_s18, 128, %s281_s20, %s266_s28  }
  0x41 PF: > { %s292_s3 = sand.u32 1, %s608_s9   ;;  %p418_p0 = pnand %p387_p12, %p705_p11 }
  0x42   : > { %s293_s25 = scalar_lea.sflag [#allocation4], %s292_s3 }
  0x43   : > { %p419_p1 = pneg %p418_p0 }
  0x45   : > { %603 = dma.done.wait (%p419_p1), %s293_s25, 128  }
  0x46   : > { %605 = vsyncadd (%p419_p1), %s293_s25, 4294967168  ;;  %s21_s14 = sadd.s32 1, %s628_s14   ;;  %s797_s9 = smov %s612_s10 }
  0x47   : > { %p18_p2 = scmp.ge.s32.totalorder %s21_s14, 4   ;;  %s798_s10 = smov %s616_s11 }
  0x48   : > { %s799_s11 = smov %s703_s23  ;;  %s800_s12 = smov %s624_s13 }
  0x49   : > { %s801_s13 = smov %s803_s17  ;;  %20 = sbr.rel (!%p18_p2) target bundleno = 8 (0x8), region = 90 }
  0x4e   :  { %299 = vsyncpa [#allocation3], 1 }
  0x4f   :  { %301 = vsyncpa [#allocation3 + $0x1], 1 }
  0x50   :  { %302 = vsyncpa [#allocation6], 1 }
  0x51   :  { %304 = vsyncpa [#allocation6 + $0x1], 1 }
  0x52   :  { %305 = vsyncpa [#allocation4], 1 }
  0x53   :  { %307 = vsyncpa [#allocation4 + $0x1], 1 }

</bundles_post_ra>
